<compile_context>
chip_gen: v7x
topology: tpu7x:2x2x1
jax: 0.10.0
libtpu: 0.0.40
codegen_flags: <defaults>
</compile_context>

<pallas_src>
import functools

import numpy as np

import jax
import jax.numpy as jnp
from jax.experimental import pallas as pl
from jax.experimental.pallas import tpu as pltpu


# Composed-receptive-field constants.
KPATCH = 7 * 7 * 3      # 147: one 7x7x3 input patch per final 8x8 position
NPOS = 8 * 8            # 64 final spatial positions per image
C1E = 3 * 3 * 12        # 108: conv1 evaluated at the 3x3 grid conv2 reads
CPAD = 128              # lane padding for expanded conv1 / conv2 channels
C2 = 24


# ----------------------------------------------------------------------------
# Fused kernel: (composed conv1) -> ReLU -> conv2 -> ReLU -> TRF linear readout
# ----------------------------------------------------------------------------
def _fused_kernel(p_ref, w1_ref, b1_ref, m_ref, w2_ref, b2_ref, bfc_ref,
                  fcb_ref, o_ref):
    # conv1 pre-activations at every position conv2 needs: (T*64, 128) f32.
    h1 = jnp.dot(p_ref[...], w1_ref[...], preferred_element_type=jnp.float32)
    # bias + ReLU in f32, then zero the conv1 positions that fall in conv2's
    # zero padding (top/left edge of the 16x16 map).
    h1 = jnp.maximum(h1 + b1_ref[...], 0.0) * m_ref[...]

    # conv2 + bias + ReLU: (T*64, 128) f32 (first 24 lanes are real channels).
    h2 = jnp.dot(h1.astype(jnp.bfloat16), w2_ref[...],
                 preferred_element_type=jnp.float32)
    h2 = jnp.maximum(h2 + b2_ref[...], 0.0)

    # TRF readout: contract over (position, channel) per image.
    tile_n = o_ref.shape[0]
    h2 = h2.reshape(tile_n, NPOS, CPAD)          # layout-preserving split
    fcb = fcb_ref[...]                           # (1, 2) f32
    y0 = jnp.sum(jnp.sum(h2 * bfc_ref[0], axis=1), axis=1, keepdims=True)
    y1 = jnp.sum(jnp.sum(h2 * bfc_ref[1], axis=1), axis=1, keepdims=True)
    o_ref[:, 0:1] = y0 + fcb[:, 0:1]
    o_ref[:, 1:2] = y1 + fcb[:, 1:2]


def _fused_forward(p2d, w1e, b1e, mask_t, w2r, b2r, bfc, fcb, *, n_pad, tile_n):
    num_tiles = n_pad // tile_n
    rows = tile_n * NPOS

    flops = 2 * n_pad * NPOS * (KPATCH * CPAD + CPAD * CPAD)
    bytes_accessed = (p2d.size * 2 + w1e.size * 2 + w2r.size * 2
                      + (b1e.size + b2r.size + mask_t.size + bfc.size
                         + fcb.size) * 4
                      + n_pad * 2 * 4)

    return pl.pallas_call(
        _fused_kernel,
        out_shape=jax.ShapeDtypeStruct((n_pad, 2), jnp.float32),
        grid=(num_tiles,),
        in_specs=[
            pl.BlockSpec((rows, KPATCH), lambda i: (i, 0)),      # patches
            pl.BlockSpec((KPATCH, CPAD), lambda i: (0, 0)),      # W1 expanded
            pl.BlockSpec((1, CPAD), lambda i: (0, 0)),           # b1 expanded
            pl.BlockSpec((rows, CPAD), lambda i: (0, 0)),        # pad mask
            pl.BlockSpec((CPAD, CPAD), lambda i: (0, 0)),        # W2
            pl.BlockSpec((1, CPAD), lambda i: (0, 0)),           # b2
            pl.BlockSpec((2, NPOS, CPAD), lambda i: (0, 0, 0)),  # FC weight
            pl.BlockSpec((1, 2), lambda i: (0, 0)),              # FC bias
        ],
        out_specs=pl.BlockSpec((tile_n, 2), lambda i: (i, 0)),
        compiler_params=pltpu.CompilerParams(
            dimension_semantics=("parallel",),
            vmem_limit_bytes=32 * 1024 * 1024,
        ),
        cost_estimate=pl.CostEstimate(flops=int(flops), transcendentals=0,
                                      bytes_accessed=int(bytes_accessed)),
    )(p2d, w1e, b1e, mask_t, w2r, b2r, bfc, fcb)


# ----------------------------------------------------------------------------
# Deterministic synthetic parameters (PyTorch layouts) + one-time packing into
# the kernel's matmul layouts (done at init, never inside the jitted forward).
# ----------------------------------------------------------------------------
def init_params(key):
    ks = jax.random.split(key, 6)
    p = {}
    p["conv1_w"] = 0.05 * jax.random.normal(ks[0], (12, 3, 3, 3), jnp.float32)
    p["conv1_b"] = 0.01 * jax.random.normal(ks[1], (12,), jnp.float32)
    p["conv2_w"] = 0.05 * jax.random.normal(ks[2], (24, 12, 3, 3), jnp.float32)
    p["conv2_b"] = 0.01 * jax.random.normal(ks[3], (24,), jnp.float32)
    p["fc_w"] = 0.02 * jax.random.normal(ks[4], (2, 24 * 8 * 8), jnp.float32)
    p["fc_b"] = 0.01 * jax.random.normal(ks[5], (2,), jnp.float32)
    return p


def pack_params(raw):
    w1 = np.asarray(raw["conv1_w"], np.float32)   # (12, 3, 3, 3) = (O, I, KH, KW)
    b1 = np.asarray(raw["conv1_b"], np.float32)
    w2 = np.asarray(raw["conv2_w"], np.float32)   # (24, 12, 3, 3)
    b2 = np.asarray(raw["conv2_b"], np.float32)
    fw = np.asarray(raw["fc_w"], np.float32)      # (2, 1536), flat = c*64+i*8+j
    fb = np.asarray(raw["fc_b"], np.float32)

    # Expanded conv1 weight: patch index (dr, dc, c) -> conv1 pre-activation at
    # the 3x3 grid (pr, pc) of conv1-output positions conv2 reads, channel c1.
    # Patch row dr corresponds to input row 4i + dr - 3; conv1 tap kh at conv1
    # position (2i + pr - 1) reads input row 4i + 2*pr + kh - 3 => dr = 2pr+kh.
    w1e6 = np.zeros((7, 7, 3, 3, 3, 12), np.float32)   # [dr, dc, c, pr, pc, c1]
    for pr in range(3):
        for pc in range(3):
            for kh in range(3):
                for kw in range(3):
                    dr, dc = 2 * pr + kh, 2 * pc + kw
                    w1e6[dr, dc, :, pr, pc, :] = w1[:, :, kh, kw].T
    w1e = w1e6.reshape(KPATCH, C1E)
    w1e = np.pad(w1e, ((0, 0), (0, CPAD - C1E)))

    b1e = np.pad(np.tile(b1, 9), (0, CPAD - C1E)).reshape(1, CPAD)

    # Zero mask for conv1 positions that land in conv2's zero padding
    # (conv1-output row/col -1, i.e. only the top/left edge).
    m = np.ones((8, 8, 3, 3, 12), np.float32)   # [i, j, pr, pc, c1]
    m[0, :, 0, :, :] = 0.0
    m[:, 0, :, 0, :] = 0.0
    mask = np.pad(m.reshape(NPOS, C1E), ((0, 0), (0, CPAD - C1E)))

    # conv2 weight as (expanded conv1 channel (pr,pc,c1), Cout2), both padded.
    w2r = np.transpose(w2, (2, 3, 1, 0)).reshape(C1E, C2)
    w2r = np.pad(w2r, ((0, CPAD - C1E), (0, CPAD - C2)))
    b2r = np.pad(b2, (0, CPAD - C2)).reshape(1, CPAD)

    # FC weight regrouped to (out_k, position i*8+j, channel c2), lane-padded.
    bfc = fw.reshape(2, C2, 8, 8).transpose(0, 2, 3, 1).reshape(2, NPOS, C2)
    bfc = np.pad(bfc, ((0, 0), (0, 0), (0, CPAD - C2)))

    return {
        "w1e": jnp.asarray(w1e, jnp.bfloat16),
        "b1e": jnp.asarray(b1e, jnp.float32),
        "mask": jnp.asarray(mask, jnp.float32),
        "w2r": jnp.asarray(w2r, jnp.bfloat16),
        "b2r": jnp.asarray(b2r, jnp.float32),
        "bfc": jnp.asarray(bfc, jnp.float32),
        "fcb": jnp.asarray(fb.reshape(1, 2), jnp.float32),
    }


# ----------------------------------------------------------------------------
# Forward: images (N,3,32,32) -> fused Pallas kernel -> (N,2)
# ----------------------------------------------------------------------------
@jax.jit
def cnn_trf_forward(packed, images):
    n = images.shape[0]
    tile_n = min(16, n)
    n_pad = ((n + tile_n - 1) // tile_n) * tile_n

    # Cheap input-only glue: NHWC, spatial pad 3, gather 7x7 stride-4 patches.
    x = jnp.transpose(images, (0, 2, 3, 1)).astype(jnp.bfloat16)   # (N,32,32,3)
    if n_pad != n:
        x = jnp.pad(x, ((0, n_pad - n), (0, 0), (0, 0), (0, 0)))
    xp = jnp.pad(x, ((0, 0), (3, 3), (3, 3), (0, 0)))              # (Np,38,38,3)
    slabs = []
    for dr in range(7):
        for dc in range(7):
            slabs.append(xp[:, dr:dr + 29:4, dc:dc + 29:4, :])     # (Np,8,8,3)
    p = jnp.stack(slabs, axis=3)                                   # (Np,8,8,49,3)
    p2d = p.reshape(n_pad * NPOS, KPATCH)                          # (Np*64,147)

    mask_t = jnp.tile(packed["mask"], (tile_n, 1))                 # (tile*64,128)

    out = _fused_forward(p2d, packed["w1e"], packed["b1e"], mask_t,
                         packed["w2r"], packed["b2r"], packed["bfc"],
                         packed["fcb"], n_pad=n_pad, tile_n=tile_n)
    return out[:n]


# ----------------------------------------------------------------------------
# Pure-JAX reference (standard conv semantics) used only for verification.
# ----------------------------------------------------------------------------
def reference_forward(raw, images):
    dn = ("NCHW", "OIHW", "NCHW")
    x = jax.lax.conv_general_dilated(images, raw["conv1_w"], (2, 2),
                                     ((1, 1), (1, 1)), dimension_numbers=dn)
    x = jax.nn.relu(x + raw["conv1_b"][None, :, None, None])
    x = jax.lax.conv_general_dilated(x, raw["conv2_w"], (2, 2),
                                     ((1, 1), (1, 1)), dimension_numbers=dn)
    x = jax.nn.relu(x + raw["conv2_b"][None, :, None, None])
    feats = x.reshape(x.shape[0], -1)
    return feats @ raw["fc_w"].T + raw["fc_b"][None, :]


if __name__ == "__main__":
    key = jax.random.PRNGKey(0)
    pkey, xkey = jax.random.split(key)
    raw = init_params(pkey)
    packed = pack_params(raw)
    images = jax.random.normal(xkey, (2, 3, 32, 32), jnp.float32)

    out = cnn_trf_forward(packed, images)
    out = jax.block_until_ready(out)
    assert out.shape == (2, 2), out.shape
    assert bool(jnp.all(jnp.isfinite(out)))

    ref = reference_forward(raw, images)
    assert bool(jnp.allclose(out, ref, rtol=2e-2, atol=2e-2)), (out, ref)

    print("KERNEL_OK")
</pallas_src>

<mosaic_0001>
module attributes {stable_mosaic.version = 11 : i64} {
  func.func @_fused_kernel(%arg0: i32, %arg1: memref<128x147xbf16, #tpu.memory_space<vmem>>, %arg2: memref<147x128xbf16, #tpu.memory_space<vmem>>, %arg3: memref<1x128xf32, #tpu.memory_space<vmem>>, %arg4: memref<128x128xf32, #tpu.memory_space<vmem>>, %arg5: memref<128x128xbf16, #tpu.memory_space<vmem>>, %arg6: memref<1x128xf32, #tpu.memory_space<vmem>>, %arg7: memref<2x64x128xf32, #tpu.memory_space<vmem>>, %arg8: memref<1x2xf32, #tpu.memory_space<vmem>>, %arg9: memref<2x2xf32, #tpu.memory_space<vmem>>) attributes {dimension_semantics = [#tpu.dimension_semantics<parallel>], iteration_bounds = array<i64: 1>, scalar_prefetch = 0 : i64, scratch_operands = 0 : i64, tpu.core_type = #tpu.core_type<tc>, window_params = [{transform_indices = @transform_0, window_bounds = array<i64: 128, 147>}, {pipeline_mode = #tpu.pipeline_mode<synchronous>, transform_indices = @transform_1, window_bounds = array<i64: 147, 128>}, {pipeline_mode = #tpu.pipeline_mode<synchronous>, transform_indices = @transform_2, window_bounds = array<i64: 1, 128>}, {pipeline_mode = #tpu.pipeline_mode<synchronous>, transform_indices = @transform_3, window_bounds = array<i64: 128, 128>}, {pipeline_mode = #tpu.pipeline_mode<synchronous>, transform_indices = @transform_4, window_bounds = array<i64: 128, 128>}, {pipeline_mode = #tpu.pipeline_mode<synchronous>, transform_indices = @transform_5, window_bounds = array<i64: 1, 128>}, {pipeline_mode = #tpu.pipeline_mode<synchronous>, transform_indices = @transform_6, window_bounds = array<i64: 2, 64, 128>}, {pipeline_mode = #tpu.pipeline_mode<synchronous>, transform_indices = @transform_7, window_bounds = array<i64: 1, 2>}, {transform_indices = @transform_8, window_bounds = array<i64: 2, 2>}]} {
    %c0 = arith.constant 0 : index
    %c0_0 = arith.constant 0 : index
    %0 = vector.load %arg1[%c0, %c0_0] : memref<128x147xbf16, #tpu.memory_space<vmem>>, vector<128x147xbf16>
    %c0_1 = arith.constant 0 : index
    %c0_2 = arith.constant 0 : index
    %1 = vector.load %arg2[%c0_1, %c0_2] : memref<147x128xbf16, #tpu.memory_space<vmem>>, vector<147x128xbf16>
    %cst = arith.constant dense<0.000000e+00> : vector<128x128xf32>
    %2 = tpu.matmul %0, %1, %cst {dimension_numbers = #tpu.dot_dimension_numbers<[1], [0], [0], [1], [0, 0, 1, 1], [], []>} : vector<128x147xbf16>, vector<147x128xbf16>, vector<128x128xf32> -> vector<128x128xf32>
    %c0_3 = arith.constant 0 : index
    %c0_4 = arith.constant 0 : index
    %3 = vector.load %arg3[%c0_3, %c0_4] : memref<1x128xf32, #tpu.memory_space<vmem>>, vector<1x128xf32>
    %4 = vector.broadcast %3 : vector<1x128xf32> to vector<128x128xf32>
    %5 = arith.addf %2, %4 : vector<128x128xf32>
    %cst_5 = arith.constant 0.000000e+00 : f32
    %6 = vector.broadcast %cst_5 : f32 to vector<128x128xf32>
    %7 = arith.maximumf %5, %6 : vector<128x128xf32>
    %c0_6 = arith.constant 0 : index
    %c0_7 = arith.constant 0 : index
    %8 = vector.load %arg4[%c0_6, %c0_7] : memref<128x128xf32, #tpu.memory_space<vmem>>, vector<128x128xf32>
    %9 = arith.mulf %7, %8 : vector<128x128xf32>
    %10 = arith.truncf %9 : vector<128x128xf32> to vector<128x128xbf16>
    %c0_8 = arith.constant 0 : index
    %c0_9 = arith.constant 0 : index
    %11 = vector.load %arg5[%c0_8, %c0_9] : memref<128x128xbf16, #tpu.memory_space<vmem>>, vector<128x128xbf16>
    %cst_10 = arith.constant dense<0.000000e+00> : vector<128x128xf32>
    %12 = tpu.matmul %10, %11, %cst_10 {dimension_numbers = #tpu.dot_dimension_numbers<[1], [0], [0], [1], [0, 0, 1, 1], [], []>} : vector<128x128xbf16>, vector<128x128xbf16>, vector<128x128xf32> -> vector<128x128xf32>
    %c0_11 = arith.constant 0 : index
    %c0_12 = arith.constant 0 : index
    %13 = vector.load %arg6[%c0_11, %c0_12] : memref<1x128xf32, #tpu.memory_space<vmem>>, vector<1x128xf32>
    %14 = vector.broadcast %13 : vector<1x128xf32> to vector<128x128xf32>
    %15 = arith.addf %12, %14 : vector<128x128xf32>
    %cst_13 = arith.constant 0.000000e+00 : f32
    %16 = vector.broadcast %cst_13 : f32 to vector<128x128xf32>
    %17 = arith.maximumf %15, %16 : vector<128x128xf32>
    %18 = vector.shape_cast %17 : vector<128x128xf32> to vector<2x64x128xf32>
    %c0_14 = arith.constant 0 : index
    %c0_15 = arith.constant 0 : index
    %19 = vector.load %arg8[%c0_14, %c0_15] : memref<1x2xf32, #tpu.memory_space<vmem>>, vector<1x2xf32>
    %c0_16 = arith.constant 0 : index
    %c0_17 = arith.constant 0 : index
    %c0_18 = arith.constant 0 : index
    %20 = vector.load %arg7[%c0_16, %c0_17, %c0_18] : memref<2x64x128xf32, #tpu.memory_space<vmem>>, vector<1x64x128xf32>
    %21 = vector.shape_cast %20 : vector<1x64x128xf32> to vector<64x128xf32>
    %22 = vector.shape_cast %21 : vector<64x128xf32> to vector<1x64x128xf32>
    %23 = vector.broadcast %22 : vector<1x64x128xf32> to vector<2x64x128xf32>
    %24 = arith.mulf %18, %23 : vector<2x64x128xf32>
    %cst_19 = arith.constant dense<0.000000e+00> : vector<2x128xf32>
    %25 = vector.multi_reduction <add>, %24, %cst_19 [1] : vector<2x64x128xf32> to vector<2x128xf32>
    %cst_20 = arith.constant dense<0.000000e+00> : vector<2xf32>
    %26 = vector.multi_reduction <add>, %25, %cst_20 [1] : vector<2x128xf32> to vector<2xf32>
    %27 = vector.shape_cast %26 : vector<2xf32> to vector<2x1xf32>
    %c1 = arith.constant 1 : index
    %c0_21 = arith.constant 0 : index
    %c0_22 = arith.constant 0 : index
    %28 = vector.load %arg7[%c1, %c0_21, %c0_22] : memref<2x64x128xf32, #tpu.memory_space<vmem>>, vector<1x64x128xf32>
    %29 = vector.shape_cast %28 : vector<1x64x128xf32> to vector<64x128xf32>
    %30 = vector.shape_cast %29 : vector<64x128xf32> to vector<1x64x128xf32>
    %31 = vector.broadcast %30 : vector<1x64x128xf32> to vector<2x64x128xf32>
    %32 = arith.mulf %18, %31 : vector<2x64x128xf32>
    %cst_23 = arith.constant dense<0.000000e+00> : vector<2x128xf32>
    %33 = vector.multi_reduction <add>, %32, %cst_23 [1] : vector<2x64x128xf32> to vector<2x128xf32>
    %cst_24 = arith.constant dense<0.000000e+00> : vector<2xf32>
    %34 = vector.multi_reduction <add>, %33, %cst_24 [1] : vector<2x128xf32> to vector<2xf32>
    %35 = vector.shape_cast %34 : vector<2xf32> to vector<2x1xf32>
    %36 = vector.extract_strided_slice %19 {offsets = [0, 0], sizes = [1, 1], strides = [1, 1]} : vector<1x2xf32> to vector<1x1xf32>
    %37 = vector.broadcast %36 : vector<1x1xf32> to vector<2x1xf32>
    %38 = arith.addf %27, %37 : vector<2x1xf32>
    %c0_25 = arith.constant 0 : index
    %c0_26 = arith.constant 0 : index
    %39 = vector.load %arg9[%c0_25, %c0_26] : memref<2x2xf32, #tpu.memory_space<vmem>>, vector<2x1xf32>
    tpu.vector_store %arg9[%c0_25, %c0_26], %38 {strides = array<i32>} : memref<2x2xf32, #tpu.memory_space<vmem>>, vector<2x1xf32>,
    %40 = vector.extract_strided_slice %19 {offsets = [0, 1], sizes = [1, 1], strides = [1, 1]} : vector<1x2xf32> to vector<1x1xf32>
    %41 = vector.broadcast %40 : vector<1x1xf32> to vector<2x1xf32>
    %42 = arith.addf %35, %41 : vector<2x1xf32>
    %c0_27 = arith.constant 0 : index
    %c1_28 = arith.constant 1 : index
    %43 = vector.load %arg9[%c0_27, %c1_28] : memref<2x2xf32, #tpu.memory_space<vmem>>, vector<2x1xf32>
    tpu.vector_store %arg9[%c0_27, %c1_28], %42 {strides = array<i32>} : memref<2x2xf32, #tpu.memory_space<vmem>>, vector<2x1xf32>,
    return
  }
  func.func @transform_0(%arg0: i32) -> (i32, i32) {
    %c0_i32 = arith.constant 0 : i32
    %c0_i32_0 = arith.constant 0 : i32
    return %arg0, %c0_i32 : i32, i32
  }
  func.func @transform_1(%arg0: i32) -> (i32, i32) {
    %c0_i32 = arith.constant 0 : i32
    %c0_i32_0 = arith.constant 0 : i32
    %c0_i32_1 = arith.constant 0 : i32
    return %c0_i32, %c0_i32_0 : i32, i32
  }
  func.func @transform_2(%arg0: i32) -> (i32, i32) {
    %c0_i32 = arith.constant 0 : i32
    %c0_i32_0 = arith.constant 0 : i32
    %c0_i32_1 = arith.constant 0 : i32
    return %c0_i32, %c0_i32_0 : i32, i32
  }
  func.func @transform_3(%arg0: i32) -> (i32, i32) {
    %c0_i32 = arith.constant 0 : i32
    %c0_i32_0 = arith.constant 0 : i32
    %c0_i32_1 = arith.constant 0 : i32
    return %c0_i32, %c0_i32_0 : i32, i32
  }
  func.func @transform_4(%arg0: i32) -> (i32, i32) {
    %c0_i32 = arith.constant 0 : i32
    %c0_i32_0 = arith.constant 0 : i32
    %c0_i32_1 = arith.constant 0 : i32
    return %c0_i32, %c0_i32_0 : i32, i32
  }
  func.func @transform_5(%arg0: i32) -> (i32, i32) {
    %c0_i32 = arith.constant 0 : i32
    %c0_i32_0 = arith.constant 0 : i32
    %c0_i32_1 = arith.constant 0 : i32
    return %c0_i32, %c0_i32_0 : i32, i32
  }
  func.func @transform_6(%arg0: i32) -> (i32, i32, i32) {
    %c0_i32 = arith.constant 0 : i32
    %c0_i32_0 = arith.constant 0 : i32
    %c0_i32_1 = arith.constant 0 : i32
    %c0_i32_2 = arith.constant 0 : i32
    return %c0_i32, %c0_i32_0, %c0_i32_1 : i32, i32, i32
  }
  func.func @transform_7(%arg0: i32) -> (i32, i32) {
    %c0_i32 = arith.constant 0 : i32
    %c0_i32_0 = arith.constant 0 : i32
    %c0_i32_1 = arith.constant 0 : i32
    return %c0_i32, %c0_i32_0 : i32, i32
  }
  func.func @transform_8(%arg0: i32) -> (i32, i32) {
    %c0_i32 = arith.constant 0 : i32
    %c0_i32_0 = arith.constant 0 : i32
    return %arg0, %c0_i32 : i32, i32
  }
}

</mosaic_0001>

<bundles_post_ra>
// kernel: cnn_trf_forward.1
= control target key start
LH: loop header
LB: loop body
LE: loop exit
PB: predicated region body
PF: predicated region fallthrough
CT: control target
= control target key end

     0   :  { %v884_v1 = vmov 0   ;;  %vm202_vm0 = vcmask 154624   ;;  %vm227_vm1 = vcmask 1040384   ;;  %s1262_s0 = inlined_call_operand.vmem [shape: bf16[128,147], index: 0, kind: input, shape index: {}]   ;;  %s1263_s1 = inlined_call_operand.vmem [shape: bf16[147,128], index: 1, kind: input, shape index: {}]   ;;  %s1264_s2 = inlined_call_operand.vmem [shape: f32[1,128], index: 2, kind: input, shape index: {}]   ;;  %s1265_s3 = inlined_call_operand.vmem [shape: f32[128,128], index: 3, kind: input, shape index: {}]   ;;  %s1266_s4 = inlined_call_operand.vmem [shape: bf16[128,128], index: 4, kind: input, shape index: {}]   ;;  %s1267_s5 = inlined_call_operand.vmem [shape: f32[1,128], index: 5, kind: input, shape index: {}]   ;;  %s1268_s6 = inlined_call_operand.vmem [shape: f32[2,64,128], index: 6, kind: input, shape index: {}]   ;;  %s1269_s7 = inlined_call_operand.vmem [shape: f32[1,2], index: 7, kind: input, shape index: {}]   ;;  %s1270_s8 = inlined_call_operand.hbm [shape: f32[2,2], index: 8, kind: output, shape index: {}]  }
   0x1   :  { %v818_v0 = vld [vmem:[%s1263_s1] sm:$0xff]   ;;  %234 = vmatprep.subr.bf16.mxu0 %v884_v1  ;;  %v819_v2 = vld [vmem:[%s1263_s1 + $0x8] sm:$0xff]   ;;  %v820_v3 = vld [vmem:[%s1263_s1 + $0x10] sm:$0xff]  }
   0x2   :  { %235 = vmatpush1.bf16.msra.mxu0 %v818_v0  ;;  %v821_v4 = vld [vmem:[%s1263_s1 + $0x18] sm:$0xff]   ;;  %v830_v5 = vld [vmem:[%s1262_s0 + $0x4] ss:$8 sps:$4 sm:$0xff]   ;;  %v824_v8 = vld [vmem:[%s1263_s1 + $0x30] sm:$0xff]  }
   0x3   :  { %236 = vmatprep.subr.bf16.mxu0 %v884_v1  ;;  %741 = vmatprep.mubr.msk.bf16.mxu0 %vm202_vm0, %v830_v5  ;;  %v822_v6 = vld [vmem:[%s1263_s1 + $0x20] sm:$0xff]   ;;  %v823_v7 = vld [vmem:[%s1263_s1 + $0x28] sm:$0xff]   ;;  %v825_v11 = vld [vmem:[%s1263_s1 + $0x38] sm:$0xff]  }
   0x4   :  { %v852_v9 = vld [vmem:[%s1266_s4] sm:$0xff]   ;;  %v853_v10 = vld [vmem:[%s1266_s4 + $0x8] sm:$0xff]   ;;  %v854_v12 = vld [vmem:[%s1266_s4 + $0x10] sm:$0xff]  }
   0x5   :  { %783 = vmatprep.subr.bf16.mxu1 %v852_v9 }
   0x6   :  { %237 = vmatpush1.bf16.msra.mxu0 %v819_v2  ;;  %784 = vmatpush3.bf16.msra.mxu1 %v852_v9 }
   0x7   :  { %238 = vmatprep.subr.bf16.mxu0 %v884_v1  ;;  %785 = vmatprep.subr.bf16.mxu1 %v853_v10 }
   0xa   :  { %239 = vmatpush1.bf16.msra.mxu0 %v820_v3 }
   0xb   :  { %240 = vmatprep.subr.bf16.mxu0 %v884_v1 }
   0xe   :  { %241 = vmatpush1.bf16.msra.mxu0 %v821_v4 }
   0xf   :  { %242 = vmatprep.subr.bf16.mxu0 %v884_v1 }
  0x12   :  { %243 = vmatpush1.bf16.msra.mxu0 %v822_v6 }
  0x13   :  { %244 = vmatprep.subr.bf16.mxu0 %v884_v1 }
  0x16   :  { %245 = vmatpush1.bf16.msra.mxu0 %v823_v7 }
  0x17   :  { %246 = vmatprep.subr.bf16.mxu0 %v884_v1 }
  0x1a   :  { %247 = vmatpush1.bf16.msra.mxu0 %v824_v8 }
  0x1b   :  { %248 = vmatprep.subr.bf16.mxu0 %v884_v1 }
  0x1c   :  { %13 = vsyncpa [#allocation3], 0  ;;  %vm228_vm2 = vcmask 1041408   ;;  %v885_v13 = vmov 65535   ;;  %786 = vmatpush3.bf16.msra.mxu1 %v853_v10  ;;  %v855_v15 = vld [vmem:[%s1266_s4 + $0x18] sm:$0xff]   ;;  %v826_v16 = vld [vmem:[%s1263_s1 + $0x40] sm:$0xff]  }
  0x1d   :  { %v229_v14 = vsel %vm227_vm1, 4294967295, %v885_v13  ;;  %787 = vmatprep.subr.bf16.mxu1 %v854_v12  ;;  %v827_v17 = vld [vmem:[%s1263_s1 + $0x48] ss:$0 sps:$4 sm:$0x33]   ;;  %v831_v21 = vld [vmem:[%s1262_s0 + $0x14] ss:$8 sps:$4 sm:$0xff]  }
  0x1e   :  { %249 = vmatpush1.bf16.msra.mxu0 %v825_v11  ;;  %v230_v18 = vsel %vm228_vm2, %v229_v14, 0  ;;  %v828_v20 = vld [vmem:[%s1262_s0] ss:$8 sps:$4 sm:$0xff]   ;;  %v833_v22 = vld [vmem:[%s1262_s0 + $0x10] ss:$8 sps:$4 sm:$0xff]   ;;  %vm624_vm3 = vcmask 1041409  }
  0x1f   :  { %250 = vmatprep.subr.bf16.mxu0 %v884_v1  ;;  %v232_v19 = vand.u32 %v827_v17, %v230_v18  ;;  %v834_v23 = vld [vmem:[%s1262_s0 + $0x24] ss:$8 sps:$4 sm:$0xff]   ;;  %v836_v24 = vld [vmem:[%s1262_s0 + $0x20] ss:$8 sps:$4 sm:$0xff]   ;;  %v837_v25 = vld [vmem:[%s1262_s0 + $0x34] ss:$8 sps:$4 sm:$0xff]  }
  0x20   :  { %788 = vmatpush3.bf16.msra.mxu1 %v854_v12  ;;  %v839_v26 = vld [vmem:[%s1262_s0 + $0x30] ss:$8 sps:$4 sm:$0xff]   ;;  %v840_v27 = vld [vmem:[%s1262_s0 + $0x44] ss:$8 sps:$4 sm:$0xff]   ;;  %v842_v28 = vld [vmem:[%s1262_s0 + $0x40] ss:$8 sps:$4 sm:$0xff]  }
  0x21   :  { %789 = vmatprep.subr.bf16.mxu1 %v855_v15  ;;  %v843_v29 = vld [vmem:[%s1262_s0 + $0x54] ss:$8 sps:$4 sm:$0xff]   ;;  %v845_v30 = vld [vmem:[%s1262_s0 + $0x50] ss:$8 sps:$4 sm:$0xff]   ;;  %v846_v31 = vld [vmem:[%s1262_s0 + $0x64] ss:$8 sps:$4 sm:$0xff]  }
  0x22   :  { %251 = vmatpush1.bf16.msra.mxu0 %v826_v16  ;;  %v848_v32 = vld [vmem:[%s1262_s0 + $0x60] ss:$8 sps:$4 sm:$0xff]   ;;  %v849_v33 = vld [vmem:[%s1262_s0 + $0x74] ss:$8 sps:$4 sm:$0xff]   ;;  %v851_v34 = vld [vmem:[%s1262_s0 + $0x70] ss:$8 sps:$4 sm:$0xff]  }
  0x23   :  { %252 = vmatprep.subr.bf16.mxu0 %v884_v1  ;;  %v856_v35 = vld [vmem:[%s1266_s4 + $0x20] sm:$0xff]   ;;  %v857_v36 = vld [vmem:[%s1266_s4 + $0x28] sm:$0xff]   ;;  %v858_v37 = vld [vmem:[%s1266_s4 + $0x30] sm:$0xff]   ;;  %vm695_vm4 = vcmask 1024   ;;  %s886_s15 = smov [#allocation2]   ;;  %vm698_vm5 = vcmask 9224  }
  0x24   :  { %790 = vmatpush3.bf16.msra.mxu1 %v855_v15  ;;  %v859_v38 = vld [vmem:[%s1266_s4 + $0x38] sm:$0xff]   ;;  %v1046_v39 = vld [vmem:[%s1264_s2] ss:$0 sm:$0xff]  ;;  %v348_v48 = vld [vmem:[%s1265_s3 + $0x8] sm:$0xff]  ;;  %s706_s16 = sshll.u32 %s886_s15, 4  ;;  %s707_s16 = int_to_ptr.vmem [resolvable:$true] %s706_s16 }
  0x25   :  { %791 = vmatprep.subr.bf16.mxu1 %v856_v35  ;;  %v347_v47 = vld [vmem:[%s1265_s3] sm:$0xff]  ;;  %v349_v60 = vld [vmem:[%s1265_s3 + $0x10] sm:$0xff]  ;;  %v350_v61 = vld [vmem:[%s1265_s3 + $0x18] sm:$0xff]  ;;  %s860_s1 = scalar_lea.vmem %s707_s16, 32  ;;  %p865_p1 = scmp.lt.s32.totalorder %s707_s16, %s707_s16 }
  0x26   :  { %253 = vmatpush1.bf16.msra.mxu0 %v232_v19  ;;  %v351_v9 = vld [vmem:[%s1265_s3 + $0x20] sm:$0xff]  ;;  %v352_v10 = vld [vmem:[%s1265_s3 + $0x28] sm:$0xff]  ;;  %p861_p0 = scmp.ne.s32.totalorder %s707_s16, %s860_s1  ;;  %p866_p2 = scmp.lt.s32.totalorder %s860_s1, %s860_s1 }
  0x28   :  { %792 = vmatpush3.bf16.msra.mxu1 %v856_v35  ;;  %v355_v35 = vld [vmem:[%s1265_s3 + $0x40] sm:$0xff]  ;;  %p867_p3 = por %p866_p2, %p865_p1 }
  0x29   :  { %267 = vmatmul.mubr.bf16.vlgmr.msra.gmra.mrb[0].mxu0 %v828_v20  ;;  %793 = vmatprep.subr.bf16.mxu1 %v857_v36 }
  0x2a   :  { %742 = vmatprep.mubr.msk.bf16.mxu0 %vm202_vm0, %v831_v21  ;;  %p868_p4 = pnand %p867_p3, %p861_p0 }
  0x2c   :  { %794 = vmatpush3.bf16.msra.mxu1 %v857_v36  ;;  %v356_v36 = vld [vmem:[%s1265_s3 + $0x48] sm:$0xff] }
  0x2d   :  { %795 = vmatprep.subr.bf16.mxu1 %v858_v37 }
  0x30   :  { %796 = vmatpush3.bf16.msra.mxu1 %v858_v37 }
  0x31   :  { %275 = vmatmul.mubr.bf16.gmra.mrb[4].mxu0 %v833_v22  ;;  %797 = vmatprep.subr.bf16.mxu1 %v859_v38  ;;  %v353_v22 = vld [vmem:[%s1265_s3 + $0x30] sm:$0xff] }
  0x32   :  { %743 = vmatprep.mubr.msk.bf16.mxu0 %vm202_vm0, %v834_v23  ;;  %v354_v23 = vld [vmem:[%s1265_s3 + $0x38] sm:$0xff] }
  0x34   :  { %798 = vmatpush3.bf16.msra.mxu1 %v859_v38 }
  0x39   :  { %283 = vmatmul.mubr.bf16.gmra.mrb[8].mxu0 %v836_v24 }
  0x3a   :  { %744 = vmatprep.mubr.msk.bf16.mxu0 %vm202_vm0, %v837_v25 }
  0x41   :  { %291 = vmatmul.mubr.bf16.gmra.mrb[12].mxu0 %v839_v26 }
  0x42   :  { %745 = vmatprep.mubr.msk.bf16.mxu0 %vm202_vm0, %v840_v27 }
  0x49   :  { %299 = vmatmul.mubr.bf16.gmra.mrb[16].mxu0 %v842_v28 }
  0x4a   :  { %746 = vmatprep.mubr.msk.bf16.mxu0 %vm202_vm0, %v843_v29 }
  0x51   :  { %307 = vmatmul.mubr.bf16.gmra.mrb[20].mxu0 %v845_v30 }
  0x52   :  { %747 = vmatprep.mubr.msk.bf16.mxu0 %vm202_vm0, %v846_v31 }
  0x59   :  { %315 = vmatmul.mubr.bf16.gmra.mrb[24].mxu0 %v848_v32 }
  0x5a   :  { %748 = vmatprep.mubr.msk.bf16.mxu0 %vm202_vm0, %v849_v33 }
  0x61   :  { %323 = vmatmul.mubr.bf16.gmra.mrb[28].mxu0 %v851_v34 }
  0xfc   :  { %v268_v40 = vpop.f32.mrb[0].mxu0 }
  0xfd   :  { %v269_v41 = vadd.f32 %v1046_v39, %v268_v40  ;;  %v270_v42 = vpop.f32.mrb[1].mxu0 }
  0xfe   :  { %v271_v43 = vpop.f32.mrb[2].mxu0 }
  0xff   :  { %v331_v44 = vmax.f32 %v269_v41, 0.0  ;;  %v272_v45 = vadd.f32 %v1046_v39, %v271_v43  ;;  %v273_v46 = vpop.f32.mrb[3].mxu0 }
 0x101   :  { %v332_v49 = vmax.f32 %v272_v45, 0.0  ;;  %v363_v50 = vmul.f32 %v347_v47, %v331_v44 }
 0x103   :  { %v364_v51 = vmul.f32 %v348_v48, %v332_v49  ;;  %v357_v49 = vld [vmem:[%s1265_s3 + $0x50] sm:$0xff] }
 0x104   :  { %v276_v52 = vpop.f32.mrb[4].mxu0 }
 0x105   :  { %v277_v53 = vadd.f32 %v1046_v39, %v276_v52  ;;  %v278_v54 = vpop.f32.mrb[5].mxu0  ;;  %v379_v55 = vpack.c.bf16 %v364_v51, %v363_v50  ;;  %v358_v50 = vld [vmem:[%s1265_s3 + $0x58] sm:$0xff] }
 0x106   :  { %v279_v56 = vpop.f32.mrb[6].mxu0 }
 0x107   :  { %v333_v57 = vmax.f32 %v277_v53, 0.0  ;;  %v280_v58 = vadd.f32 %v1046_v39, %v279_v56  ;;  %v281_v59 = vpop.f32.mrb[7].mxu0  ;;  %799 = vmatprep.mubr.bf16.mxu1 %v379_v55 }
 0x109   :  { %v334_v62 = vmax.f32 %v280_v58, 0.0  ;;  %v365_v63 = vmul.f32 %v349_v60, %v333_v57 }
 0x10b   :  { %v366_v0 = vmul.f32 %v350_v61, %v334_v62  ;;  %v359_v62 = vld [vmem:[%s1265_s3 + $0x60] sm:$0xff] }
 0x10c   :  { %v284_v1 = vpop.f32.mrb[8].mxu0 }
 0x10d   :  { %v285_v2 = vadd.f32 %v1046_v39, %v284_v1  ;;  %v286_v3 = vpop.f32.mrb[9].mxu0  ;;  %v380_v4 = vpack.c.bf16 %v366_v0, %v365_v63  ;;  %v360_v63 = vld [vmem:[%s1265_s3 + $0x68] sm:$0xff] }
 0x10e   :  { %v287_v5 = vpop.f32.mrb[10].mxu0 }
 0x10f   :  { %v335_v6 = vmax.f32 %v285_v2, 0.0  ;;  %v288_v7 = vadd.f32 %v1046_v39, %v287_v5  ;;  %v289_v8 = vpop.f32.mrb[11].mxu0  ;;  %800 = vmatmul.mubr.bf16.vlgmr.msra.gmra.mrb[0].mxu1 %v380_v4 }
 0x111   :  { %v336_v11 = vmax.f32 %v288_v7, 0.0  ;;  %v367_v12 = vmul.f32 %v351_v9, %v335_v6 }
 0x113   :  { %v368_v13 = vmul.f32 %v352_v10, %v336_v11  ;;  %v361_v11 = vld [vmem:[%s1265_s3 + $0x70] sm:$0xff] }
 0x114   :  { %v292_v14 = vpop.f32.mrb[12].mxu0 }
 0x115   :  { %v293_v15 = vadd.f32 %v1046_v39, %v292_v14  ;;  %v294_v16 = vpop.f32.mrb[13].mxu0  ;;  %v381_v17 = vpack.c.bf16 %v368_v13, %v367_v12  ;;  %v362_v12 = vld [vmem:[%s1265_s3 + $0x78] sm:$0xff] }
 0x116   :  { %v295_v18 = vpop.f32.mrb[14].mxu0 }
 0x117   :  { %v337_v19 = vmax.f32 %v293_v15, 0.0  ;;  %v296_v20 = vadd.f32 %v1046_v39, %v295_v18  ;;  %v297_v21 = vpop.f32.mrb[15].mxu0  ;;  %803 = vmatprep.mubr.bf16.mxu1 %v381_v17  ;;  %v1115_v17 = vld [vmem:[%s1267_s5] ss:$0 sm:$0xff] }
 0x119   :  { %v338_v24 = vmax.f32 %v296_v20, 0.0  ;;  %v369_v25 = vmul.f32 %v353_v22, %v337_v19 }
 0x11b   :  { %v370_v26 = vmul.f32 %v354_v23, %v338_v24 }
 0x11c   :  { %v300_v27 = vpop.f32.mrb[16].mxu0 }
 0x11d   :  { %v301_v28 = vadd.f32 %v1046_v39, %v300_v27  ;;  %v302_v29 = vpop.f32.mrb[17].mxu0  ;;  %v382_v30 = vpack.c.bf16 %v370_v26, %v369_v25  ;;  %v1123_v25 = vld [vmem:[%s1268_s6] sm:$0xff] }
 0x11e   :  { %v303_v31 = vpop.f32.mrb[18].mxu0  ;;  %v1129_v27 = vld [vmem:[%s1268_s6 + $0x40] sm:$0xff]  ;;  %v1139_v29 = vld [vmem:[%s1268_s6 + $0x48] sm:$0xff] }
 0x11f   :  { %v339_v32 = vmax.f32 %v301_v28, 0.0  ;;  %v304_v33 = vadd.f32 %v1046_v39, %v303_v31  ;;  %v305_v34 = vpop.f32.mrb[19].mxu0  ;;  %804 = vmatmul.mubr.bf16.gmra.mrb[4].mxu1 %v382_v30  ;;  %v1134_v28 = vld [vmem:[%s1268_s6 + $0x8] sm:$0xff] }
 0x121   :  { %v340_v37 = vmax.f32 %v304_v33, 0.0  ;;  %v371_v38 = vmul.f32 %v355_v35, %v339_v32  ;;  %v1144_v32 = vld [vmem:[%s1268_s6 + $0x10] sm:$0xff] }
 0x122   :  { %v1149_v33 = vld [vmem:[%s1268_s6 + $0x50] sm:$0xff] }
 0x123   :  { %v372_v40 = vmul.f32 %v356_v36, %v340_v37 }
 0x124   :  { %v308_v41 = vpop.f32.mrb[20].mxu0 }
 0x125   :  { %v309_v42 = vadd.f32 %v1046_v39, %v308_v41  ;;  %v310_v43 = vpop.f32.mrb[21].mxu0  ;;  %v383_v44 = vpack.c.bf16 %v372_v40, %v371_v38  ;;  %v1158_v40 = vld [vmem:[%s1268_s6 + $0x18] sm:$0xff] }
 0x126   :  { %v311_v45 = vpop.f32.mrb[22].mxu0  ;;  %v1163_v41 = vld [vmem:[%s1268_s6 + $0x58] sm:$0xff] }
 0x127   :  { %v341_v46 = vmax.f32 %v309_v42, 0.0  ;;  %v312_v47 = vadd.f32 %v1046_v39, %v311_v45  ;;  %v313_v48 = vpop.f32.mrb[23].mxu0  ;;  %807 = vmatprep.mubr.bf16.mxu1 %v383_v44 }
 0x129   :  { %v342_v51 = vmax.f32 %v312_v47, 0.0  ;;  %v373_v52 = vmul.f32 %v357_v49, %v341_v46 }
 0x12b   :  { %v374_v53 = vmul.f32 %v358_v50, %v342_v51 }
 0x12c   :  { %v316_v54 = vpop.f32.mrb[24].mxu0 }
 0x12d   :  { %v317_v55 = vadd.f32 %v1046_v39, %v316_v54  ;;  %v318_v56 = vpop.f32.mrb[25].mxu0  ;;  %v384_v57 = vpack.c.bf16 %v374_v53, %v373_v52 }
 0x12e   :  { %v319_v58 = vpop.f32.mrb[26].mxu0 }
 0x12f   :  { %v343_v59 = vmax.f32 %v317_v55, 0.0  ;;  %v320_v60 = vadd.f32 %v1046_v39, %v319_v58  ;;  %v321_v61 = vpop.f32.mrb[27].mxu0  ;;  %808 = vmatmul.mubr.bf16.gmra.mrb[8].mxu1 %v384_v57  ;;  %v1174_v57 = vld [vmem:[%s1268_s6 + $0x20] sm:$0xff] }
 0x130   :  { %v1179_v58 = vld [vmem:[%s1268_s6 + $0x60] sm:$0xff] }
 0x131   :  { %v344_v0 = vmax.f32 %v320_v60, 0.0  ;;  %v375_v1 = vmul.f32 %v359_v62, %v343_v59 }
 0x133   :  { %v376_v2 = vmul.f32 %v360_v63, %v344_v0  ;;  %v1186_v63 = vld [vmem:[%s1268_s6 + $0x28] sm:$0xff] }
 0x134   :  { %v324_v3 = vpop.f32.mrb[28].mxu0  ;;  %v1191_v0 = vld [vmem:[%s1268_s6 + $0x68] sm:$0xff] }
 0x135   :  { %v325_v4 = vadd.f32 %v1046_v39, %v324_v3  ;;  %v326_v5 = vpop.f32.mrb[29].mxu0  ;;  %v385_v6 = vpack.c.bf16 %v376_v2, %v375_v1 }
 0x136   :  { %v327_v7 = vpop.f32.mrb[30].mxu0  ;;  %v1198_v5 = vld [vmem:[%s1268_s6 + $0x30] sm:$0xff] }
 0x137   :  { %v345_v8 = vmax.f32 %v325_v4, 0.0  ;;  %v328_v9 = vadd.f32 %v1046_v39, %v327_v7  ;;  %v329_v10 = vpop.f32.mrb[31].mxu0  ;;  %811 = vmatprep.mubr.bf16.mxu1 %v385_v6  ;;  %v1203_v6 = vld [vmem:[%s1268_s6 + $0x70] sm:$0xff] }
 0x139   :  { %v346_v13 = vmax.f32 %v328_v9, 0.0  ;;  %v377_v14 = vmul.f32 %v361_v11, %v345_v8 }
 0x13b   :  { %v378_v15 = vmul.f32 %v362_v12, %v346_v13  ;;  %v1210_v12 = vld [vmem:[%s1268_s6 + $0x38] sm:$0xff] }
 0x13c   :  { %v1215_v13 = vld [vmem:[%s1268_s6 + $0x78] sm:$0xff] }
 0x13d   :  { %v386_v16 = vpack.c.bf16 %v378_v15, %v377_v14 }
 0x13f   :  { %812 = vmatmul.mubr.bf16.gmra.mrb[12].mxu1 %v386_v16 }
 0x1e2   :  { %v801_v39 = vpop.f32.mrb[0].mxu1 }
 0x1e3   :  { %v492_v18 = vpop.f32.mrb[1].mxu1  ;;  %v501_v19 = vadd.f32 %v801_v39, %v1115_v17 }
 0x1e4   :  { %v493_v20 = vadd.f32 %v1115_v17, %v492_v18  ;;  %v802_v21 = vpop.f32.mrb[2].mxu1 }
 0x1e5   :  { %v504_v22 = vadd.f32 %v802_v21, %v1115_v17  ;;  %v495_v23 = vpop.f32.mrb[3].mxu1  ;;  %v557_v30 = vmax.f32 %v501_v19, 0.0 }
 0x1e6   :  { %v555_v24 = vmax.f32 %v493_v20, 0.0  ;;  %v496_v26 = vadd.f32 %v1115_v17, %v495_v23 }
 0x1e7   :  { %v558_v34 = vmax.f32 %v504_v22, 0.0  ;;  %v582_v42 = vmul.f32 %v1144_v32, %v557_v30  ;;  %v641_v43 = vmul.f32 %v1149_v33, %v557_v30 }
 0x1e8   :  { %v556_v31 = vmax.f32 %v496_v26, 0.0  ;;  %v580_v35 = vmul.f32 %v1123_v25, %v555_v24  ;;  %v639_v36 = vmul.f32 %v1129_v27, %v555_v24 }
 0x1e9   :  { %v583_v46 = vmul.f32 %v1158_v40, %v558_v34  ;;  %v642_v47 = vmul.f32 %v1163_v41, %v558_v34 }
 0x1ea   :  { %v581_v37 = vmul.f32 %v1134_v28, %v556_v31  ;;  %v640_v38 = vmul.f32 %v1139_v29, %v556_v31 }
 0x1ec   :  { %v596_v44 = vadd.f32 %v581_v37, %v580_v35  ;;  %v655_v45 = vadd.f32 %v640_v38, %v639_v36 }
 0x1ee   :  { %v597_v48 = vadd.f32 %v596_v44, %v582_v42  ;;  %v656_v49 = vadd.f32 %v655_v45, %v641_v43 }
 0x1f0   :  { %v598_v50 = vadd.f32 %v597_v48, %v583_v46  ;;  %v657_v51 = vadd.f32 %v656_v49, %v642_v47 }
 0x1f2   :  { %v805_v52 = vpop.f32.mrb[4].mxu1 }
 0x1f3   :  { %v508_v53 = vpop.f32.mrb[5].mxu1  ;;  %v517_v54 = vadd.f32 %v805_v52, %v1115_v17 }
 0x1f4   :  { %v509_v55 = vadd.f32 %v1115_v17, %v508_v53  ;;  %v806_v56 = vpop.f32.mrb[6].mxu1 }
 0x1f5   :  { %v520_v59 = vadd.f32 %v806_v56, %v1115_v17  ;;  %v511_v60 = vpop.f32.mrb[7].mxu1  ;;  %v561_v1 = vmax.f32 %v517_v54, 0.0 }
 0x1f6   :  { %v559_v61 = vmax.f32 %v509_v55, 0.0  ;;  %v512_v62 = vadd.f32 %v1115_v17, %v511_v60 }
 0x1f7   :  { %v562_v7 = vmax.f32 %v520_v59, 0.0  ;;  %v586_v14 = vmul.f32 %v1198_v5, %v561_v1  ;;  %v645_v15 = vmul.f32 %v1203_v6, %v561_v1 }
 0x1f8   :  { %v584_v2 = vmul.f32 %v1174_v57, %v559_v61  ;;  %v643_v3 = vmul.f32 %v1179_v58, %v559_v61  ;;  %v560_v4 = vmax.f32 %v512_v62, 0.0 }
 0x1f9   :  { %v587_v18 = vmul.f32 %v1210_v12, %v562_v7  ;;  %v646_v19 = vmul.f32 %v1215_v13, %v562_v7 }
 0x1fa   :  { %v599_v8 = vadd.f32 %v598_v50, %v584_v2  ;;  %v658_v9 = vadd.f32 %v657_v51, %v643_v3  ;;  %v585_v10 = vmul.f32 %v1186_v63, %v560_v4  ;;  %v644_v11 = vmul.f32 %v1191_v0, %v560_v4 }
 0x1fc   :  { %v600_v16 = vadd.f32 %v599_v8, %v585_v10  ;;  %v659_v39 = vadd.f32 %v658_v9, %v644_v11 }
 0x1fe   :  { %v601_v20 = vadd.f32 %v600_v16, %v586_v14  ;;  %v660_v21 = vadd.f32 %v659_v39, %v645_v15 }
 0x200   :  { %v602_v22 = vadd.f32 %v601_v20, %v587_v18  ;;  %v661_v23 = vadd.f32 %v660_v21, %v646_v19 }
 0x202   :  { %v809_v24 = vpop.f32.mrb[8].mxu1  ;;  %v662_v2 = vrot.slane %v661_v23, 4 }
 0x203   :  { %v524_v26 = vpop.f32.mrb[9].mxu1  ;;  %v533_v30 = vadd.f32 %v809_v24, %v1115_v17 }
 0x204   :  { %v525_v31 = vadd.f32 %v1115_v17, %v524_v26  ;;  %v810_v34 = vpop.f32.mrb[10].mxu1  ;;  %v663_v16 = vadd.f32 %v662_v2, %v661_v23 }
 0x205   :  { %v536_v35 = vadd.f32 %v810_v34, %v1115_v17  ;;  %v527_v36 = vpop.f32.mrb[11].mxu1  ;;  %v565_v42 = vmax.f32 %v533_v30, 0.0 }
 0x206   :  { %v563_v37 = vmax.f32 %v525_v31, 0.0  ;;  %v528_v38 = vadd.f32 %v1115_v17, %v527_v36 }
 0x207   :  { %v566_v44 = vmax.f32 %v536_v35, 0.0  ;;  %v590_v49 = vmul.f32 %v1144_v32, %v565_v42  ;;  %v649_v50 = vmul.f32 %v1149_v33, %v565_v42 }
 0x208   :  { %v564_v43 = vmax.f32 %v528_v38, 0.0  ;;  %v588_v45 = vmul.f32 %v1123_v25, %v563_v37  ;;  %v647_v46 = vmul.f32 %v1129_v27, %v563_v37 }
 0x209   :  { %v591_v53 = vmul.f32 %v1158_v40, %v566_v44  ;;  %v650_v54 = vmul.f32 %v1163_v41, %v566_v44  ;;  %v603_v40 = vrot.slane %v602_v22, 4 }
 0x20a   :  { %v589_v47 = vmul.f32 %v1134_v28, %v564_v43  ;;  %v648_v48 = vmul.f32 %v1139_v29, %v564_v43 }
 0x20b   :  { %v604_v15 = vadd.f32 %v603_v40, %v602_v22 }
 0x20c   :  { %v609_v51 = vadd.f32 %v589_v47, %v588_v45  ;;  %v668_v52 = vadd.f32 %v648_v48, %v647_v46 }
 0x20d   :  { %v605_v30 = vrot.slane %v604_v15, 2 }
 0x20e   :  { %v610_v55 = vadd.f32 %v609_v51, %v590_v49  ;;  %v669_v56 = vadd.f32 %v668_v52, %v649_v50  ;;  %v766_v51 = vld [vmem:[%s1269_s7] ss:$0 sm:$0xff] }
 0x20f   :  { %v606_v22 = vadd.f32 %v605_v30, %v604_v15 }
 0x210   :  { %v611_v59 = vadd.f32 %v610_v55, %v591_v53  ;;  %v670_v25 = vadd.f32 %v669_v56, %v650_v54 }
 0x211   :  { %v607_v36 = vrot.slane %v606_v22, 1 }
 0x212   :  { %v813_v60 = vpop.f32.mrb[12].mxu1 }
 0x213   :  { %v540_v27 = vpop.f32.mrb[13].mxu1  ;;  %v549_v28 = vadd.f32 %v813_v60, %v1115_v17  ;;  %v608_v43 = vadd.f32 %v607_v36, %v606_v22 }
 0x214   :  { %v541_v29 = vadd.f32 %v1115_v17, %v540_v27  ;;  %v814_v61 = vpop.f32.mrb[14].mxu1 }
 0x215   :  { %v552_v32 = vadd.f32 %v814_v61, %v1115_v17  ;;  %v543_v33 = vpop.f32.mrb[15].mxu1  ;;  %v569_v41 = vmax.f32 %v549_v28, 0.0 }
 0x216   :  { %v567_v62 = vmax.f32 %v541_v29, 0.0  ;;  %v544_v1 = vadd.f32 %v1115_v17, %v543_v33 }
 0x217   :  { %v570_v8 = vmax.f32 %v552_v32, 0.0  ;;  %v594_v39 = vmul.f32 %v1198_v5, %v569_v41  ;;  %v653_v17 = vmul.f32 %v1203_v6, %v569_v41 }
 0x218   :  { %v592_v3 = vmul.f32 %v1174_v57, %v567_v62  ;;  %v651_v4 = vmul.f32 %v1179_v58, %v567_v62  ;;  %v568_v7 = vmax.f32 %v544_v1, 0.0 }
 0x219   :  { %v595_v57 = vmul.f32 %v1210_v12, %v570_v8  ;;  %v654_v58 = vmul.f32 %v1215_v13, %v570_v8 }
 0x21a   :  { %v612_v9 = vadd.f32 %v611_v59, %v592_v3  ;;  %v671_v10 = vadd.f32 %v670_v25, %v651_v4  ;;  %v593_v11 = vmul.f32 %v1186_v63, %v568_v7  ;;  %v652_v14 = vmul.f32 %v1191_v0, %v568_v7 }
 0x21b   :  { %v664_v63 = vrot.slane %v663_v16, 2 }
 0x21c   :  { %v613_v18 = vadd.f32 %v612_v9, %v593_v11  ;;  %v672_v19 = vadd.f32 %v671_v10, %v652_v14 }
 0x21d   :  { %v665_v34 = vadd.f32 %v664_v63, %v663_v16 }
 0x21e   :  { %v614_v20 = vadd.f32 %v613_v18, %v594_v39  ;;  %v673_v21 = vadd.f32 %v672_v19, %v653_v17 }
 0x21f   :  { %v666_v38 = vrot.slane %v665_v34, 1 }
 0x220   :  { %v615_v24 = vadd.f32 %v614_v20, %v595_v57  ;;  %v674_v26 = vadd.f32 %v673_v21, %v654_v58 }
 0x221   :  { %v667_v45 = vadd.f32 %v666_v38, %v665_v34 }
 0x222   :  { %v616_v31 = vrot.slane %v615_v24, 4  ;;  %v675_v0 = vrot.slane %v674_v26, 4 }
 0x224   :  { %v617_v23 = vadd.f32 %v616_v31, %v615_v24  ;;  %v676_v5 = vadd.f32 %v675_v0, %v674_v26 }
 0x226   :  { %v618_v35 = vrot.slane %v617_v23, 2  ;;  %v677_v6 = vrot.slane %v676_v5, 2 }
 0x228   :  { %v619_v37 = vadd.f32 %v618_v35, %v617_v23  ;;  %v678_v12 = vadd.f32 %v677_v6, %v676_v5 }
 0x22a   :  { %v620_v42 = vrot.slane %v619_v37, 1  ;;  %v679_v13 = vrot.slane %v678_v12, 1 }
 0x22c   :  { %v621_v44 = vadd.f32 %v620_v42, %v619_v37  ;;  %v680_v46 = vadd.f32 %v679_v13, %v678_v12 }
 0x22e   :  { %v625_v47 = vsel %vm624_vm3, %v621_v44, %v608_v43  ;;  %v683_v48 = vsel %vm624_vm3, %v680_v46, %v667_v45 }
 0x22f   :  { %v627_v49 = vsel %vm228_vm2, %v625_v47, 0.0  ;;  %v685_v50 = vsel %vm228_vm2, %v683_v48, 0.0 }
 0x230   :  { %628 = vadd.xlane.f32.xlu0 %v627_v49 }
 0x234   :  { %686 = vadd.xlane.f32.xlu0 %v685_v50 }
 0x2bd   :  { %v629_v52 = vpop.xlane.xlu0 %628 }
 0x2be   :  { %v694_v53 = vadd.f32 %v766_v51, %v629_v52 }
 0x2c0   :  { %696 = vst.msk [vmem:[#allocation2] sm:$0x3] %vm695_vm4, %v694_v53 }
 0x2c1   :  { %v687_v54 = vpop.xlane.xlu0 %686 }
 0x2c2   :  { %v697_v55 = vadd.f32 %v766_v51, %v687_v54 }
 0x2c4   :  { %699 = vst.msk [vmem:[#allocation2] sm:$0x3] %vm698_vm5, %v697_v55 }
 0x2c5   :  { %871 = shalt.err (!%p868_p4)
}
 0x2c6   :  { %s872_s18 = scalar_lea.hbm %s1270_s8, 32 }
 0x2c7   :  { %p873_p5 = scmp.ne.s32.totalorder %s1270_s8, %s872_s18  ;;  %p876_p6 = scmp.lt.u32.totalorder %s872_s18, %s1270_s8 }
 0x2c9   :  { %p878_p7 = pnand %p876_p6, %p873_p5 }
 0x2cb   :  { %881 = shalt.err (!%p878_p7)
}
 0x2cc   :  { %709 = dma.vmem_to_hbm [thread:$0]  %s707_s16, 32, %s1270_s8, [#allocation3]  }
 0x2cd   :  { %882 = dma.done.wait [#allocation3], 32  }
 0x2ce   :  { %883 = vsyncadd [#allocation3], 4294967264 }
 0x2cf   :  { %713 = vsyncpa [#allocation3], 1 }

</bundles_post_ra>
